<compile_context>
chip_gen: v6e
topology: v6e:2x2x1
jax: 0.10.0
libtpu: 0.0.40
codegen_flags: <defaults>
</compile_context>

<pallas_src>
import jax
import jax.numpy as jnp
from jax import lax
from jax.experimental import pallas as pl
from jax.experimental.pallas import tpu as pltpu


def fcn_kernel(x_ref, w1_ref, b1_ref, w2_ref, b2_ref, w3_ref, b3_ref, o_ref):
    # Cast the streamed f32 x tile to bf16 in-kernel (VPU).
    x = x_ref[...].astype(jnp.bfloat16)                                # (TB, 64)

    # Hidden layer 1: bf16 MXU inputs, f32 accumulation; bias + relu in f32.
    h1 = jnp.dot(x, w1_ref[...], preferred_element_type=jnp.float32)   # (TB, 64)
    h1 = jnp.maximum(h1 + b1_ref[...], 0.0)

    # Hidden layer 2.
    h2 = jnp.dot(h1.astype(jnp.bfloat16), w2_ref[...],
                 preferred_element_type=jnp.float32)                   # (TB, 128)
    h2 = jnp.maximum(h2 + b2_ref[...], 0.0)

    # Output layer (out_features == 1), lane-dense: contract w3 (1,128) against
    # bf16 h2 (TB,128) on their last dims -> (1, TB).  No explicit f32 transpose;
    # this is the same "A @ B^T" MXU pattern as q @ k.T in attention.
    out_row = lax.dot_general(
        w3_ref[...], h2.astype(jnp.bfloat16),
        dimension_numbers=(((1,), (1,)), ((), ())),
        preferred_element_type=jnp.float32)                            # (1, TB)
    out_row = out_row + b3_ref[0, 0]                                   # SMEM scalar
    o_ref[...] = out_row.reshape(o_ref.shape).astype(o_ref.dtype)


def _round_up(x, m):
    return ((x + m - 1) // m) * m


def fcn_forward(x, params, tile_b=2048):
    """Eval-mode forward of FullyConnectedNet. Returns (B, 1) float32."""
    (w1, b1), (w2, b2), (w3, b3) = params
    B, in_f = x.shape
    h1_f = w1.shape[1]
    h2_f = w2.shape[1]
    assert w3.shape == (1, h2_f) and b3.shape == (1, 1)

    # Batch tile: force a multiple of 128 (sublane dim of the x block and lane
    # dim of the output block), cap at 8192 so f32 intermediates stay well under
    # every generation's scoped-VMEM default (v5e 16 MiB, v6e/v7x 32 MiB), and
    # cap at round_up(B, 128) so tiny batches don't over-pad.
    tile_b = max(128, (int(tile_b) // 128) * 128)
    tile_b = min(tile_b, 8192, _round_up(B, 128))
    num_tiles = pl.cdiv(B, tile_b)

    # Only the batch-independent weights are pre-cast to bf16; x stays f32 and
    # is cast per-tile inside the kernel (no extra HBM pass over x, no pad copy).
    w1b = w1.astype(jnp.bfloat16)
    w2b = w2.astype(jnp.bfloat16)
    w3b = w3.astype(jnp.bfloat16)

    # Rough per-step VMEM estimate (double-buffered x + f32/bf16 intermediates);
    # only raise the scoped-VMEM limit when a very large tile actually needs it.
    est_vmem = tile_b * 2048 + (1 << 20)
    vmem_limit = (64 << 20) if est_vmem > (12 << 20) else None

    out = pl.pallas_call(
        fcn_kernel,
        out_shape=jax.ShapeDtypeStruct((num_tiles, 1, tile_b), jnp.float32),
        grid=(num_tiles,),
        in_specs=[
            # x: one f32 batch tile per grid step (auto double-buffered).  The
            # ragged last tile is a partially-OOB block: rows >= B read
            # undefined data, are row-independent, and are sliced off below.
            pl.BlockSpec((tile_b, in_f), lambda i: (i, 0)),
            # Weights / biases: constant index maps -> resident in VMEM.
            pl.BlockSpec((in_f, h1_f), lambda i: (0, 0)),    # w1 (bf16)
            pl.BlockSpec((1, h1_f), lambda i: (0, 0)),       # b1 (f32)
            pl.BlockSpec((h1_f, h2_f), lambda i: (0, 0)),    # w2 (bf16)
            pl.BlockSpec((1, h2_f), lambda i: (0, 0)),       # b2 (f32)
            pl.BlockSpec((1, h2_f), lambda i: (0, 0)),       # w3 row (bf16)
            # b3: scalar in SMEM (a (1,1) VMEM block would still occupy a padded
            # (8,128) tile and a vector load per step).
            pl.BlockSpec(memory_space=pltpu.MemorySpace.SMEM),
        ],
        # Lane-dense output: batch lives on the lane axis of each (1,1,TB) block.
        out_specs=pl.BlockSpec((1, 1, tile_b), lambda i: (i, 0, 0)),
        compiler_params=pltpu.CompilerParams(
            dimension_semantics=("parallel",),
            vmem_limit_bytes=vmem_limit),
    )(x, w1b, b1, w2b, b2, w3b, b3)

    # (num_tiles, 1, tile_b) -> flatten in batch order -> (B, 1); drops the
    # garbage rows from the partially-OOB last tile.
    return out.reshape(num_tiles * tile_b, 1)[:B]


def init_params(key, input_size=64, hidden_sizes=(64, 128), output_size=1):
    """PyTorch nn.Linear-style init (uniform +/- 1/sqrt(fan_in)).

    Hidden weights stored [in, out] (kernel computes x @ W); the output layer is
    stored as a row vector [out=1, in] with a (1, 1) bias.
    """
    params = []
    in_f = input_size
    dims = list(hidden_sizes) + [output_size]
    for li, out_f in enumerate(dims):
        key, kw, kb = jax.random.split(key, 3)
        bound = 1.0 / (in_f ** 0.5)
        if li < len(hidden_sizes):
            w = jax.random.uniform(kw, (in_f, out_f), jnp.float32, -bound, bound)
        else:
            w = jax.random.uniform(kw, (out_f, in_f), jnp.float32, -bound, bound)
        b = jax.random.uniform(kb, (1, out_f), jnp.float32, -bound, bound)
        params.append((w, b))
        in_f = out_f
    return params


if __name__ == "__main__":
    key = jax.random.PRNGKey(0)
    key, kx = jax.random.split(key)

    batch = 300              # deliberately not a tile multiple: exercises the
    input_size = 64          # partially-OOB last tile + [:B] slice
    hidden_sizes = (64, 128)
    output_size = 1

    x = jax.random.normal(kx, (batch, input_size), jnp.float32)
    params = init_params(key, input_size, hidden_sizes, output_size)
    (w1, b1), (w2, b2), (w3, b3) = params

    out = fcn_forward(x, params, tile_b=128)   # grid of 3 batch tiles
    jax.block_until_ready(out)

    # Pure-JAX reference with matched bf16 matmul inputs / f32 accumulation
    # (eval-mode dropout = identity).
    xb = x.astype(jnp.bfloat16)
    h1 = jnp.maximum(
        jnp.dot(xb, w1.astype(jnp.bfloat16),
                preferred_element_type=jnp.float32) + b1, 0.0)
    h2 = jnp.maximum(
        jnp.dot(h1.astype(jnp.bfloat16), w2.astype(jnp.bfloat16),
                preferred_element_type=jnp.float32) + b2, 0.0)
    ref = jnp.dot(h2.astype(jnp.bfloat16), w3.astype(jnp.bfloat16).T,
                  preferred_element_type=jnp.float32) + b3

    assert out.shape == (batch, output_size)
    assert jnp.allclose(out, ref, atol=1e-2, rtol=1e-2), (
        float(jnp.max(jnp.abs(out - ref))))

    print("KERNEL_OK")
</pallas_src>

<mosaic_0001>
module attributes {stable_mosaic.version = 11 : i64} {
  func.func @fcn_kernel(%arg0: i32, %arg1: memref<128x64xf32, #tpu.memory_space<vmem>>, %arg2: memref<64x64xbf16, #tpu.memory_space<vmem>>, %arg3: memref<1x64xf32, #tpu.memory_space<vmem>>, %arg4: memref<64x128xbf16, #tpu.memory_space<vmem>>, %arg5: memref<1x128xf32, #tpu.memory_space<vmem>>, %arg6: memref<1x128xbf16, #tpu.memory_space<vmem>>, %arg7: memref<1x1xf32, #tpu.memory_space<smem>>, %arg8: memref<1x1x128xf32, #tpu.memory_space<vmem>>) attributes {dimension_semantics = [#tpu.dimension_semantics<parallel>], iteration_bounds = array<i64: 3>, scalar_prefetch = 0 : i64, scratch_operands = 0 : i64, tpu.core_type = #tpu.core_type<tc>, window_params = [{transform_indices = @transform_0, window_bounds = array<i64: 128, 64>}, {pipeline_mode = #tpu.pipeline_mode<synchronous>, transform_indices = @transform_1, window_bounds = array<i64: 64, 64>}, {pipeline_mode = #tpu.pipeline_mode<synchronous>, transform_indices = @transform_2, window_bounds = array<i64: 1, 64>}, {pipeline_mode = #tpu.pipeline_mode<synchronous>, transform_indices = @transform_3, window_bounds = array<i64: 64, 128>}, {pipeline_mode = #tpu.pipeline_mode<synchronous>, transform_indices = @transform_4, window_bounds = array<i64: 1, 128>}, {pipeline_mode = #tpu.pipeline_mode<synchronous>, transform_indices = @transform_5, window_bounds = array<i64: 1, 128>}, {transform_indices = @transform_6, window_bounds = array<i64: 1, 1>}, {transform_indices = @transform_7, window_bounds = array<i64: 1, 1, 128>}]} {
    %c0 = arith.constant 0 : index
    %c0_0 = arith.constant 0 : index
    %0 = vector.load %arg1[%c0, %c0_0] : memref<128x64xf32, #tpu.memory_space<vmem>>, vector<128x64xf32>
    %1 = arith.truncf %0 : vector<128x64xf32> to vector<128x64xbf16>
    %c0_1 = arith.constant 0 : index
    %c0_2 = arith.constant 0 : index
    %2 = vector.load %arg2[%c0_1, %c0_2] : memref<64x64xbf16, #tpu.memory_space<vmem>>, vector<64x64xbf16>
    %cst = arith.constant dense<0.000000e+00> : vector<128x64xf32>
    %3 = tpu.matmul %1, %2, %cst {dimension_numbers = #tpu.dot_dimension_numbers<[1], [0], [0], [1], [0, 0, 1, 1], [], []>} : vector<128x64xbf16>, vector<64x64xbf16>, vector<128x64xf32> -> vector<128x64xf32>
    %c0_3 = arith.constant 0 : index
    %c0_4 = arith.constant 0 : index
    %4 = vector.load %arg3[%c0_3, %c0_4] : memref<1x64xf32, #tpu.memory_space<vmem>>, vector<1x64xf32>
    %5 = vector.broadcast %4 : vector<1x64xf32> to vector<128x64xf32>
    %6 = arith.addf %3, %5 : vector<128x64xf32>
    %cst_5 = arith.constant 0.000000e+00 : f32
    %7 = vector.broadcast %cst_5 : f32 to vector<128x64xf32>
    %8 = arith.maximumf %6, %7 : vector<128x64xf32>
    %9 = arith.truncf %8 : vector<128x64xf32> to vector<128x64xbf16>
    %c0_6 = arith.constant 0 : index
    %c0_7 = arith.constant 0 : index
    %10 = vector.load %arg4[%c0_6, %c0_7] : memref<64x128xbf16, #tpu.memory_space<vmem>>, vector<64x128xbf16>
    %cst_8 = arith.constant dense<0.000000e+00> : vector<128x128xf32>
    %11 = tpu.matmul %9, %10, %cst_8 {dimension_numbers = #tpu.dot_dimension_numbers<[1], [0], [0], [1], [0, 0, 1, 1], [], []>} : vector<128x64xbf16>, vector<64x128xbf16>, vector<128x128xf32> -> vector<128x128xf32>
    %c0_9 = arith.constant 0 : index
    %c0_10 = arith.constant 0 : index
    %12 = vector.load %arg5[%c0_9, %c0_10] : memref<1x128xf32, #tpu.memory_space<vmem>>, vector<1x128xf32>
    %13 = vector.broadcast %12 : vector<1x128xf32> to vector<128x128xf32>
    %14 = arith.addf %11, %13 : vector<128x128xf32>
    %cst_11 = arith.constant 0.000000e+00 : f32
    %15 = vector.broadcast %cst_11 : f32 to vector<128x128xf32>
    %16 = arith.maximumf %14, %15 : vector<128x128xf32>
    %c0_12 = arith.constant 0 : index
    %c0_13 = arith.constant 0 : index
    %17 = vector.load %arg6[%c0_12, %c0_13] : memref<1x128xbf16, #tpu.memory_space<vmem>>, vector<1x128xbf16>
    %18 = arith.truncf %16 : vector<128x128xf32> to vector<128x128xbf16>
    %cst_14 = arith.constant dense<0.000000e+00> : vector<1x128xf32>
    %19 = tpu.matmul %17, %18, %cst_14 {dimension_numbers = #tpu.dot_dimension_numbers<[1], [1], [0], [0], [0, 0, 1, 0], [], []>} : vector<1x128xbf16>, vector<128x128xbf16>, vector<1x128xf32> -> vector<1x128xf32>
    %c0_15 = arith.constant 0 : index
    %c0_16 = arith.constant 0 : index
    %20 = memref.load %arg7[%c0_15, %c0_16] : memref<1x1xf32, #tpu.memory_space<smem>>
    %21 = vector.broadcast %20 : f32 to vector<1x128xf32>
    %22 = arith.addf %19, %21 : vector<1x128xf32>
    %23 = vector.shape_cast %22 : vector<1x128xf32> to vector<1x1x128xf32>
    %c0_17 = arith.constant 0 : index
    %c0_18 = arith.constant 0 : index
    %c0_19 = arith.constant 0 : index
    %24 = vector.load %arg8[%c0_17, %c0_18, %c0_19] : memref<1x1x128xf32, #tpu.memory_space<vmem>>, vector<1x1x128xf32>
    tpu.vector_store %arg8[%c0_17, %c0_18, %c0_19], %23 {strides = array<i32>} : memref<1x1x128xf32, #tpu.memory_space<vmem>>, vector<1x1x128xf32>,
    return
  }
  func.func @transform_0(%arg0: i32) -> (i32, i32) {
    %c0_i32 = arith.constant 0 : i32
    %c0_i32_0 = arith.constant 0 : i32
    return %arg0, %c0_i32 : i32, i32
  }
  func.func @transform_1(%arg0: i32) -> (i32, i32) {
    %c0_i32 = arith.constant 0 : i32
    %c0_i32_0 = arith.constant 0 : i32
    %c0_i32_1 = arith.constant 0 : i32
    return %c0_i32, %c0_i32_0 : i32, i32
  }
  func.func @transform_2(%arg0: i32) -> (i32, i32) {
    %c0_i32 = arith.constant 0 : i32
    %c0_i32_0 = arith.constant 0 : i32
    %c0_i32_1 = arith.constant 0 : i32
    return %c0_i32, %c0_i32_0 : i32, i32
  }
  func.func @transform_3(%arg0: i32) -> (i32, i32) {
    %c0_i32 = arith.constant 0 : i32
    %c0_i32_0 = arith.constant 0 : i32
    %c0_i32_1 = arith.constant 0 : i32
    return %c0_i32, %c0_i32_0 : i32, i32
  }
  func.func @transform_4(%arg0: i32) -> (i32, i32) {
    %c0_i32 = arith.constant 0 : i32
    %c0_i32_0 = arith.constant 0 : i32
    %c0_i32_1 = arith.constant 0 : i32
    return %c0_i32, %c0_i32_0 : i32, i32
  }
  func.func @transform_5(%arg0: i32) -> (i32, i32) {
    %c0_i32 = arith.constant 0 : i32
    %c0_i32_0 = arith.constant 0 : i32
    %c0_i32_1 = arith.constant 0 : i32
    return %c0_i32, %c0_i32_0 : i32, i32
  }
  func.func @transform_6(%arg0: i32) -> (i32, i32) {
    %c0_i32 = arith.constant 0 : i32
    %c0_i32_0 = arith.constant 0 : i32
    %c0_i32_1 = arith.constant 0 : i32
    return %c0_i32, %c0_i32_0 : i32, i32
  }
  func.func @transform_7(%arg0: i32) -> (i32, i32, i32) {
    %c0_i32 = arith.constant 0 : i32
    %c0_i32_0 = arith.constant 0 : i32
    %c0_i32_1 = arith.constant 0 : i32
    return %arg0, %c0_i32, %c0_i32_0 : i32, i32, i32
  }
}

</mosaic_0001>

<bundles_post_ra>
// kernel: tpu_custom_call.1
= control target key start
LH: loop header
LB: loop body
LE: loop exit
PB: predicated region body
PF: predicated region fallthrough
CT: control target
= control target key end

     0   :  { %s1272_s0 = inlined_call_operand.vmem [shape: f32[300,64], index: 0, kind: input, shape index: {}]   ;;  %s1273_s1 = inlined_call_operand.vmem [shape: bf16[64,64], index: 1, kind: input, shape index: {}]   ;;  %s1274_s2 = inlined_call_operand.vmem [shape: f32[1,64], index: 2, kind: input, shape index: {}]   ;;  %s1275_s3 = inlined_call_operand.vmem [shape: bf16[64,128], index: 3, kind: input, shape index: {}]   ;;  %s1276_s4 = inlined_call_operand.vmem [shape: f32[1,128], index: 4, kind: input, shape index: {}]   ;;  %s1277_s5 = inlined_call_operand.vmem [shape: bf16[1,128], index: 5, kind: input, shape index: {}]   ;;  %s1278_s6 = inlined_call_operand.<no memory space> [shape: f32[1,1], index: 6, kind: input, shape index: {}]   ;;  %s1279_s7 = inlined_call_operand.hbm [shape: f32[3,1,128], index: 7, kind: output, shape index: {}]  }
   0x1   :  { %12 = sst [smem:[#allocation2]] %s1278_s6 }
   0x2   :  { %13 = vsyncpa [#allocation4], 0 }
   0x3   :  { %15 = vsyncpa [#allocation4 + $0x1], 0  ;;  %s1098_s26 = smov 0   ;;  %s1100_s27 = smov 0  }
   0x4   :  { %s1102_s28 = smov 0   ;;  %s1104_s29 = smov 0  }
   0x5 LB: > { %s804_s6 = sadd.s32 4294967295, %s1050_s29   ;;  %s805_s30 = sadd.s32 4294967294, %s1050_s29   ;;  %s1050_s29 = sphi %s1104_s29, %s1285_s29   ;;  %s1046_s28 = sphi %s1102_s28, %s1284_s28   ;;  %s1042_s27 = sphi %s1100_s27, %s1283_s27   ;;  %s1038_s26 = sphi %s1098_s26, %s1282_s26  }
   0x6   : > { %s1121_s8 = sadd.s32 1, %s1050_s29   ;;  %s180_s9 = sadd.s32 1, %s1046_s28 }
   0x7   : > { %s177_s10 = ssub.s32 %s1050_s29, %s1121_s8  ;;  %p190_p0 = scmp.ne.s32.totalorder %s1046_s28, %s1042_s27 }
   0x8   : > { %p178_p1 = scmp.eq.s32.totalorder %s177_s10, 0  ;;  %p191_p2 = scmp.eq.s32.totalorder %s804_s6, 2 }
   0x9   : > { %p196_p3 = scmp.ne.s32.totalorder %s1042_s27, %s1038_s26  ;;  %p197_p4 = scmp.eq.s32.totalorder %s805_s30, 2 }
   0xa   : > { %s1131_s11 = scalar_select %p178_p1, %s1046_s28, %s180_s9  }
   0xb   : > { %p1133_p5 = por %p191_p2, %p190_p0  ;;  %p1137_p6 = por %p197_p4, %p196_p3 }
   0xc   : > { %p808_p7 = scmp.ge.s32.totalorder %s1050_s29, 1  ;;  %p250_p8 = scmp.lt.s32.totalorder %s1050_s29, 4 }
   0xe   : > { %p251_p9 = pnand %p808_p7, %p250_p8 }
   0xf   : > { %s1146_s16 = sshll.u32 (!%p251_p9), %s804_s6, 4  ;;  %s694_s30 = sld [smem:[#allocation2]] (!%p251_p9) }
  0x10   : > { %254 = sbr.rel (%p251_p9) target bundleno = 743 (0x2e7), region = 48  ;;  %p290_p10 = scmp.lt.s32.totalorder (!%p251_p9), %s1146_s16, 37 }
  0x11   : > { %s283_s9 = sand.u32 (!%p251_p9), 1, %s1042_s27   ;;  %s1231_s18 = scalar_lea.hbm (!%p251_p9), %s1279_s7, %s1146_s16 }
  0x12   : > { %s284_s10 = scalar_lea.vmem (!%p251_p9), [#allocation3], %s283_s9  ;;  %s1054_s21 = smov (!%p251_p9), [#allocation3]  }
  0x13   : > { %s750_s14 = sshll.u32 (!%p251_p9), %s284_s10, 4  ;;  %s1233_s14 = int_to_ptr.vmem [resolvable:$true] %s750_s14 }
  0x14   : > { %s990_s20 = scalar_lea.vmem (!%p251_p9), %s1233_s14, 16 }
  0x15   : > { %v982_v0 = vld [vmem:[%s1273_s1 + $0x18] sm:$0xff]   ;;  %v983_v1 = vld [vmem:[%s1273_s1 + $0x10] sm:$0xff]   ;;  %s291_s19 = scalar_select %p290_p10, %s1146_s16, 37  ;;  %v984_v2 = vld [vmem:[%s1273_s1 + $0x8] sm:$0xff]   ;;  %vm363_vm0 = vcmask 523264   ;;  %vm1053_vm1 = vmmov 0  }
  0x16   : > { %873 = vmatprep.subr.bf16.mxu1 %v982_v0  ;;  %v985_v5 = vld [vmem:[%s1273_s1] sm:$0xff]   ;;  %v986_v7 = vld [vmem:[%s1275_s3 + $0x18] sm:$0xff]   ;;  %v987_v14 = vld [vmem:[%s1275_s3 + $0x10] sm:$0xff]   ;;  %p991_p11 = scmp.ne.s32.totalorder %s1233_s14, %s990_s20 }
  0x17   : > { %874 = vmatpush3.bf16.msra.mxu1 %v982_v0  ;;  %s810_s22 = sshll.u32 %s291_s19, 3  ;;  %v988_v19 = vld [vmem:[%s1275_s3 + $0x8] sm:$0xff]   ;;  %v989_v31 = vld [vmem:[%s1275_s3] sm:$0xff]   ;;  %s738_s19 = scalar_lea.sflag [#allocation4], %s283_s9 }
  0x18   : > { %875 = vmatprep.subr.bf16.mxu1 %v983_v1  ;;  %s1159_s25 = scalar_lea.vmem %s1272_s0, %s810_s22  ;;  %v811_v34 = vld [vmem:[%s1274_s2] ss:$0 sm:$0xff]  ;;  %p992_p12 = pnand %p991_p11, %p1133_p5 }
  0x19   : > { %v300_v3 = vld [vmem:[%s1159_s25] sm:$0xff]  ;;  %v301_v4 = vld [vmem:[%s1159_s25 + $0x8] sm:$0xff]  ;;  %v302_v8 = vld [vmem:[%s1159_s25 + $0x10] sm:$0xff]  ;;  %s994_s22 = sshll.u32 %s1054_s21, 4  ;;  %s995_s22 = int_to_ptr.vmem [resolvable:$false] %s994_s22 }
  0x1a   : > { %v316_v6 = vpack.c.bf16 %v301_v4, %v300_v3  ;;  %v303_v9 = vld [vmem:[%s1159_s25 + $0x18] sm:$0xff]  ;;  %v304_v10 = vld [vmem:[%s1159_s25 + $0x20] sm:$0xff]  ;;  %v305_v11 = vld [vmem:[%s1159_s25 + $0x28] sm:$0xff]  ;;  %p993_p13 = pneg %p992_p12  ;;  %s996_s23 = scalar_lea.vmem %s995_s22, 32 }
  0x1b   : > { %876 = vmatpush3.bf16.msra.mxu1 %v983_v1  ;;  %v317_v12 = vpack.c.bf16 %v303_v9, %v302_v8  ;;  %v318_v13 = vpack.c.bf16 %v305_v11, %v304_v10  ;;  %v306_v15 = vld [vmem:[%s1159_s25 + $0x30] sm:$0xff]  ;;  %v307_v16 = vld [vmem:[%s1159_s25 + $0x38] sm:$0xff]  ;;  %v308_v17 = vld [vmem:[%s1159_s25 + $0x40] sm:$0xff]  ;;  %p997_p0 = scmp.lt.s32.totalorder %s1233_s14, %s995_s22  ;;  %p998_p1 = scmp.lt.s32.totalorder %s996_s23, %s990_s20 }
  0x1c   : > { %877 = vmatprep.subr.bf16.mxu1 %v984_v2  ;;  %881 = vmatprep.mubr.msk.bf16.mxu1 %vm363_vm0, %v316_v6  ;;  %v309_v18 = vld [vmem:[%s1159_s25 + $0x48] sm:$0xff]  ;;  %v319_v20 = vpack.c.bf16 %v307_v16, %v306_v15  ;;  %v310_v22 = vld [vmem:[%s1159_s25 + $0x50] sm:$0xff]  ;;  %v311_v23 = vld [vmem:[%s1159_s25 + $0x58] sm:$0xff] }
  0x1d   : > { %v320_v21 = vpack.c.bf16 %v309_v18, %v308_v17  ;;  %v312_v24 = vld [vmem:[%s1159_s25 + $0x60] sm:$0xff]  ;;  %v313_v25 = vld [vmem:[%s1159_s25 + $0x68] sm:$0xff]  ;;  %v321_v26 = vpack.c.bf16 %v311_v23, %v310_v22  ;;  %v314_v28 = vld [vmem:[%s1159_s25 + $0x70] sm:$0xff]  ;;  %p999_p2 = por %p998_p1, %p997_p0 }
  0x1e   : > { %v322_v27 = vpack.c.bf16 %v313_v25, %v312_v24  ;;  %v315_v29 = vld [vmem:[%s1159_s25 + $0x78] sm:$0xff]  ;;  %v1052_v25 = vmov 0.0  }
  0x1f   : > { %878 = vmatpush3.bf16.msra.mxu1 %v984_v2  ;;  %v323_v30 = vpack.c.bf16 %v315_v29, %v314_v28  ;;  %921 = vmatprep.subr.bf16.mxu0 %v1052_v25  ;;  %p1000_p3 = pnand %p999_p2, %p993_p13 }
  0x20   : > { %879 = vmatprep.subr.bf16.mxu1 %v985_v5  ;;  %937 = vmatprep.mubr.msk.bf16.mxu0 %vm1053_vm1, %v1052_v25 }
  0x23   : > { %880 = vmatpush3.bf16.msra.mxu1 %v985_v5 }
  0x24   : > { %897 = vmatprep.subr.bf16.mxu1 %v986_v7 }
  0x26   : > { %882 = vmatmul.mubr.msk.bf16.vlgmr.msra.gmra.mxu1 %vm363_vm0, %v317_v12 }
  0x27   : > { %885 = vmatprep.mubr.msk.bf16.mxu1 %vm363_vm0, %v318_v13  ;;  %898 = vmatpush3.bf16.msra.mxu1 %v986_v7 }
  0x28   : > { %899 = vmatprep.subr.bf16.mxu1 %v987_v14 }
  0x2b   : > { %900 = vmatpush3.bf16.msra.mxu1 %v987_v14 }
  0x2c   : > { %901 = vmatprep.subr.bf16.mxu1 %v988_v19 }
  0x2e   : > { %886 = vmatmul.mubr.msk.bf16.gmra.mxu1 %vm363_vm0, %v319_v20 }
  0x2f   : > { %889 = vmatprep.mubr.msk.bf16.mxu1 %vm363_vm0, %v320_v21  ;;  %902 = vmatpush3.bf16.msra.mxu1 %v988_v19 }
  0x30   : > { %903 = vmatprep.subr.bf16.mxu1 %v989_v31 }
  0x33   : > { %904 = vmatpush3.bf16.msra.mxu1 %v989_v31 }
  0x36   : > { %890 = vmatmul.mubr.msk.bf16.gmra.mxu1 %vm363_vm0, %v321_v26 }
  0x37   : > { %893 = vmatprep.mubr.msk.bf16.mxu1 %vm363_vm0, %v322_v27  ;;  %v824_v27 = vld [vmem:[%s1276_s4] ss:$0 sm:$0xff] }
  0x3e   : > { %894 = vmatmul.mubr.msk.bf16.gmra.mxu1 %vm363_vm0, %v323_v30 }
  0xe6   : > { %v883_v32 = vpop.f32.mrf.mxu1 }
  0xe7   : > { %v431_v38 = vadd.f32 %v883_v32, %v811_v34 }
  0xe8   : > { %v422_v33 = vpop.f32.mrf.mxu1 }
  0xe9   : > { %v423_v36 = vadd.f32 %v811_v34, %v422_v33  ;;  %v487_v45 = vmax.f32 %v431_v38, 0.0 }
  0xea   : > { %v884_v35 = vpop.f32.mrf.mxu1 }
  0xeb   : > { %v434_v37 = vadd.f32 %v884_v35, %v811_v34  ;;  %v485_v43 = vmax.f32 %v423_v36, 0.0 }
  0xec   : > { %v425_v39 = vpop.f32.mrf.mxu1 }
  0xed   : > { %v426_v40 = vadd.f32 %v811_v34, %v425_v39  ;;  %v488_v41 = vmax.f32 %v434_v37, 0.0 }
  0xee   : > { %v887_v42 = vpop.f32.mrf.mxu1 }
  0xef   : > { %v486_v44 = vmax.f32 %v426_v40, 0.0  ;;  %v502_v48 = vpack.c.bf16 %v488_v41, %v487_v45  ;;  %v447_v52 = vadd.f32 %v887_v42, %v811_v34 }
  0xf0   : > { %v438_v46 = vpop.f32.mrf.mxu1 }
  0xf1   : > { %v501_v47 = vpack.c.bf16 %v486_v44, %v485_v43  ;;  %v439_v50 = vadd.f32 %v811_v34, %v438_v46  ;;  %v491_v59 = vmax.f32 %v447_v52, 0.0 }
  0xf2   : > { %v888_v49 = vpop.f32.mrf.mxu1 }
  0xf3   : > { %v450_v51 = vadd.f32 %v888_v49, %v811_v34  ;;  %905 = vmatprep.mubr.msk.bf16.mxu1 %vm363_vm0, %v501_v47  ;;  %v489_v57 = vmax.f32 %v439_v50, 0.0 }
  0xf4   : > { %v441_v53 = vpop.f32.mrf.mxu1  ;;  %906 = vmatmul.mubr.msk.bf16.vlgmr.msra.gmra.mxu1 %vm363_vm0, %v502_v48 }
  0xf5   : > { %v442_v54 = vadd.f32 %v811_v34, %v441_v53  ;;  %v492_v55 = vmax.f32 %v450_v51, 0.0 }
  0xf6   : > { %v891_v56 = vpop.f32.mrf.mxu1 }
  0xf7   : > { %v490_v58 = vmax.f32 %v442_v54, 0.0  ;;  %v504_v62 = vpack.c.bf16 %v492_v55, %v491_v59  ;;  %v463_v2 = vadd.f32 %v891_v56, %v811_v34 }
  0xf8   : > { %v454_v60 = vpop.f32.mrf.mxu1 }
  0xf9   : > { %v503_v61 = vpack.c.bf16 %v490_v58, %v489_v57  ;;  %v455_v0 = vadd.f32 %v811_v34, %v454_v60  ;;  %v495_v9 = vmax.f32 %v463_v2, 0.0 }
  0xfa   : > { %v892_v63 = vpop.f32.mrf.mxu1 }
  0xfb   : > { %v466_v1 = vadd.f32 %v892_v63, %v811_v34  ;;  %909 = vmatprep.mubr.msk.bf16.mxu1 %vm363_vm0, %v503_v61  ;;  %v493_v7 = vmax.f32 %v455_v0, 0.0 }
  0xfc   : > { %v457_v3 = vpop.f32.mrf.mxu1  ;;  %910 = vmatmul.mubr.msk.bf16.gmra.mxu1 %vm363_vm0, %v504_v62 }
  0xfd   : > { %v458_v4 = vadd.f32 %v811_v34, %v457_v3  ;;  %v496_v5 = vmax.f32 %v466_v1, 0.0 }
  0xfe   : > { %v895_v6 = vpop.f32.mrf.mxu1 }
  0xff   : > { %v494_v8 = vmax.f32 %v458_v4, 0.0  ;;  %v506_v12 = vpack.c.bf16 %v496_v5, %v495_v9  ;;  %v479_v16 = vadd.f32 %v895_v6, %v811_v34 }
 0x100   : > { %v470_v10 = vpop.f32.mrf.mxu1 }
 0x101   : > { %v505_v11 = vpack.c.bf16 %v494_v8, %v493_v7  ;;  %v471_v14 = vadd.f32 %v811_v34, %v470_v10  ;;  %v499_v22 = vmax.f32 %v479_v16, 0.0 }
 0x102   : > { %v896_v13 = vpop.f32.mrf.mxu1 }
 0x103   : > { %v482_v15 = vadd.f32 %v896_v13, %v811_v34  ;;  %913 = vmatprep.mubr.msk.bf16.mxu1 %vm363_vm0, %v505_v11  ;;  %v497_v20 = vmax.f32 %v471_v14, 0.0 }
 0x104   : > { %v473_v17 = vpop.f32.mrf.mxu1  ;;  %914 = vmatmul.mubr.msk.bf16.gmra.mxu1 %vm363_vm0, %v506_v12 }
 0x105   : > { %v474_v18 = vadd.f32 %v811_v34, %v473_v17  ;;  %v500_v19 = vmax.f32 %v482_v15, 0.0 }
 0x107   : > { %v498_v21 = vmax.f32 %v474_v18, 0.0  ;;  %v508_v24 = vpack.c.bf16 %v500_v19, %v499_v22  ;;  %v685_v19 = vld [vmem:[%s1277_s5] sm:$0x1] }
 0x109   : > { %v507_v23 = vpack.c.bf16 %v498_v21, %v497_v20  ;;  %v695_v20 = vstv %s694_s30 }
 0x10b   : > { %917 = vmatprep.mubr.msk.bf16.mxu1 %vm363_vm0, %v507_v23 }
 0x10c   : > { %918 = vmatmul.mubr.msk.bf16.gmra.mxu1 %vm363_vm0, %v508_v24 }
 0x1b4   : > { %v907_v26 = vpop.f32.mrf.mxu1 }
 0x1b5   : > { %v615_v29 = vadd.f32 %v907_v26, %v824_v27 }
 0x1b6   : > { %v606_v28 = vpop.f32.mrf.mxu1 }
 0x1b7   : > { %v607_v31 = vadd.f32 %v824_v27, %v606_v28  ;;  %v671_v34 = vmax.f32 %v615_v29, 0.0 }
 0x1b8   : > { %v908_v30 = vpop.f32.mrf.mxu1 }
 0x1b9   : > { %v618_v32 = vadd.f32 %v908_v30, %v824_v27  ;;  %v669_v38 = vmax.f32 %v607_v31, 0.0 }
 0x1ba   : > { %v609_v33 = vpop.f32.mrf.mxu1 }
 0x1bb   : > { %v672_v35 = vmax.f32 %v618_v32, 0.0  ;;  %v610_v36 = vadd.f32 %v824_v27, %v609_v33 }
 0x1bc   : > { %v911_v37 = vpop.f32.mrf.mxu1 }
 0x1bd   : > { %v687_v39 = vpack.c.bf16 %v672_v35, %v671_v34  ;;  %v670_v40 = vmax.f32 %v610_v36, 0.0  ;;  %v631_v10 = vadd.f32 %v911_v37, %v824_v27 }
 0x1be   : > { %v622_v41 = vpop.f32.mrf.mxu1 }
 0x1bf   : > { %v686_v42 = vpack.c.bf16 %v670_v40, %v669_v38  ;;  %v675_v12 = vmax.f32 %v631_v10, 0.0  ;;  %v623_v15 = vadd.f32 %v824_v27, %v622_v41 }
 0x1c0   : > { %v912_v43 = vpop.f32.mrf.mxu1 }
 0x1c1   : > { %v634_v8 = vadd.f32 %v912_v43, %v824_v27  ;;  %v673_v17 = vmax.f32 %v623_v15, 0.0 }
 0x1c2   : > { %v625_v44 = vpop.f32.mrf.mxu1 }
 0x1c3   : > { %v676_v11 = vmax.f32 %v634_v8, 0.0  ;;  %v626_v14 = vadd.f32 %v824_v27, %v625_v44 }
 0x1c4   : > { %v915_v45 = vpop.f32.mrf.mxu1 }
 0x1c5   : > { %v647_v0 = vadd.f32 %v915_v45, %v824_v27  ;;  %v689_v13 = vpack.c.bf16 %v676_v11, %v675_v12  ;;  %v674_v16 = vmax.f32 %v626_v14, 0.0 }
 0x1c6   : > { %v638_v46 = vpop.f32.mrf.mxu1 }
 0x1c7   : > { %v679_v2 = vmax.f32 %v647_v0, 0.0  ;;  %v639_v5 = vadd.f32 %v824_v27, %v638_v46  ;;  %v688_v18 = vpack.c.bf16 %v674_v16, %v673_v17 }
 0x1c8   : > { %v916_v47 = vpop.f32.mrf.mxu1 }
 0x1c9   : > { %v650_v62 = vadd.f32 %v916_v47, %v824_v27  ;;  %v677_v7 = vmax.f32 %v639_v5, 0.0 }
 0x1ca   : > { %v641_v48 = vpop.f32.mrf.mxu1 }
 0x1cb   : > { %v680_v1 = vmax.f32 %v650_v62, 0.0  ;;  %v642_v4 = vadd.f32 %v824_v27, %v641_v48 }
 0x1cc   : > { %v919_v49 = vpop.f32.mrf.mxu1 }
 0x1cd   : > { %v663_v51 = vadd.f32 %v919_v49, %v824_v27  ;;  %v691_v3 = vpack.c.bf16 %v680_v1, %v679_v2  ;;  %v678_v6 = vmax.f32 %v642_v4, 0.0 }
 0x1ce   : > { %v654_v50 = vpop.f32.mrf.mxu1 }
 0x1cf   : > { %v683_v55 = vmax.f32 %v663_v51, 0.0  ;;  %v655_v59 = vadd.f32 %v824_v27, %v654_v50  ;;  %v690_v9 = vpack.c.bf16 %v678_v6, %v677_v7 }
 0x1d0   : > { %v920_v52 = vpop.f32.mrf.mxu1 }
 0x1d1   : > { %v666_v53 = vadd.f32 %v920_v52, %v824_v27  ;;  %v681_v61 = vmax.f32 %v655_v59, 0.0 }
 0x1d2   : > { %v657_v54 = vpop.f32.mrf.mxu1 }
 0x1d3   : > { %v684_v56 = vmax.f32 %v666_v53, 0.0  ;;  %v658_v57 = vadd.f32 %v824_v27, %v657_v54 }
 0x1d5   : > { %v693_v58 = vpack.c.bf16 %v684_v56, %v683_v55  ;;  %v682_v60 = vmax.f32 %v658_v57, 0.0 }
 0x1d7   : > { %922 = vmatpush3.bf16.xpose.msra.mxu0 %v693_v58  ;;  %v692_v63 = vpack.c.bf16 %v682_v60, %v681_v61 }
 0x1d8   : > { %923 = vmatprep.subr.bf16.mxu0 %v1052_v25 }
 0x1df   : > { %924 = vmatpush3.bf16.xpose.msra.mxu0 %v692_v63 }
 0x1e0   : > { %925 = vmatprep.subr.bf16.mxu0 %v1052_v25 }
 0x1e7   : > { %926 = vmatpush3.bf16.xpose.msra.mxu0 %v691_v3 }
 0x1e8   : > { %927 = vmatprep.subr.bf16.mxu0 %v1052_v25 }
 0x1ef   : > { %928 = vmatpush3.bf16.xpose.msra.mxu0 %v690_v9 }
 0x1f0   : > { %929 = vmatprep.subr.bf16.mxu0 %v1052_v25 }
 0x1f7   : > { %930 = vmatpush3.bf16.xpose.msra.mxu0 %v689_v13 }
 0x1f8   : > { %931 = vmatprep.subr.bf16.mxu0 %v1052_v25 }
 0x1ff   : > { %932 = vmatpush3.bf16.xpose.msra.mxu0 %v688_v18 }
 0x200   : > { %933 = vmatprep.subr.bf16.mxu0 %v1052_v25 }
 0x207   : > { %934 = vmatpush3.bf16.xpose.msra.mxu0 %v687_v39 }
 0x208   : > { %935 = vmatprep.subr.bf16.mxu0 %v1052_v25 }
 0x20f   : > { %936 = vmatpush3.bf16.xpose.msra.mxu0 %v686_v42 }
 0x216   : > { %938 = vmatmul.mubr.bf16.vlgmr.msra.gmra.mxu0 %v685_v19 }
 0x2d6   : > { %v730_v21 = vpop.f32.mrf.mxu0 }
 0x2d7   : > { %v731_v22 = vadd.f32 %v730_v21, %v695_v20 }
 0x2d8   : > { %v939_v23 = vpop.f32.mrf.mxu0 }
 0x2d9   : > { %736 = vst [vmem:[%s284_s10] sm:$0x1] %v731_v22 }
 0x2da   : > { %v733_v24 = vpop.f32.mrf.mxu0 }
 0x2db   : > { %1003 = shalt.err (!%p1000_p3)
}
 0x2dc   : > { %s1004_s16 = scalar_lea.hbm %s1231_s18, 16  ;;  %s1008_s6 = scalar_lea.hbm %s1279_s7, 48 }
 0x2dd   : > { %p1005_p4 = scmp.ne.s32.totalorder %s1231_s18, %s1004_s16  ;;  %p1009_p9 = scmp.lt.s32.totalorder %s1231_s18, %s1279_s7 }
 0x2de   : > { %p1010_p10 = scmp.lt.s32.totalorder %s1008_s6, %s1004_s16 }
 0x2df   : > { %p1006_p7 = pnand %p1005_p4, %p1133_p5 }
 0x2e0   : > { %p1011_p11 = por %p1010_p10, %p1009_p9 }
 0x2e1   : > { %p1007_p8 = pneg %p1006_p7 }
 0x2e3   : > { %p1012_p12 = pnand %p1011_p11, %p1007_p8 }
 0x2e5   : > { %1015 = shalt.err (!%p1012_p12)
}
 0x2e6   : > { %941 = dma.vmem_to_hbm [thread:$0]  (%p1133_p5), %s1233_s14, 16, %s1231_s18, %s738_s19   ;;  %v940_v25 = vpop.f32.mrf.mxu0 }
 0x2e7 PF: > { %p947_p13 = scmp.ge.s32.totalorder %s1050_s29, 2  ;;  %s762_s10 = sand.u32 1, %s1038_s26  }
 0x2e8   : > { %s763_s15 = scalar_lea.sflag [#allocation4], %s762_s10 }
 0x2e9   : > { %p944_p0 = pnand %p947_p13, %p1137_p6 }
 0x2eb   : > { %p945_p1 = pneg %p944_p0 }
 0x2ed   : > { %1033 = dma.done.wait (%p945_p1), %s763_s15, 16  }
 0x2ee   : > { %1035 = vsyncadd (%p945_p1), %s763_s15, 4294967280  ;;  %p18_p2 = scmp.ge.s32.totalorder %s1121_s8, 5   ;;  %s1282_s26 = smov %s1042_s27 }
 0x2ef   : > { %s1283_s27 = smov %s1046_s28  ;;  %s1284_s28 = smov %s1131_s11 }
 0x2f0   : > { %s1285_s29 = smov %s1121_s8  ;;  %20 = sbr.rel (!%p18_p2) target bundleno = 5 (0x5), region = 83 }
 0x2f5   :  { %767 = vsyncpa [#allocation4], 1 }
 0x2f6   :  { %769 = vsyncpa [#allocation4 + $0x1], 1 }

</bundles_post_ra>
